<compile_context>
chip_gen: v5e
topology: v5e:2x2
jax: 0.10.0
libtpu: 0.0.40
codegen_flags: <defaults>
</compile_context>

<pallas_src>
import functools
import math

import jax
import jax.numpy as jnp
from jax.experimental import pallas as pl
from jax.experimental.pallas import tpu as pltpu


_NBUF = 4                      # outstanding HBM->HBM DMAs (4-8 saturates the DMA engines)
_TARGET_CHUNK_BYTES = 4 << 20  # multi-MiB chunks amortize per-DMA overhead on v5e/v6e/v7x


def _flatten_dma_kernel(x_hbm, o_hbm, sems, *, chunk_rows, m):
    """Chunked HBM->HBM copy of an (m, n) slab with up to _NBUF in-flight DMAs."""
    n_full = m // chunk_rows
    tail = m - n_full * chunk_rows
    n_chunks = n_full + (1 if tail else 0)

    def copy(row_start, rows, slot):
        return pltpu.make_async_copy(
            x_hbm.at[pl.ds(row_start, rows), :],
            o_hbm.at[pl.ds(row_start, rows), :],
            sems.at[slot],
        )

    # Full-size chunks: before reusing a semaphore slot, retire the DMA that
    # last used it (all in-loop DMAs transfer exactly `chunk_rows` rows, so a
    # fixed-size descriptor waits the right byte count).
    @pl.loop(0, n_full)
    def _(i):
        slot = i % _NBUF

        @pl.when(i >= _NBUF)
        def _():
            copy(0, chunk_rows, slot).wait()

        row_start = pl.multiple_of(i * chunk_rows, chunk_rows)
        copy(row_start, chunk_rows, slot).start()

    # Ragged tail chunk (static size), issued after the full chunks.
    if tail:
        slot = n_full % _NBUF
        if n_full >= _NBUF:
            copy(0, chunk_rows, slot).wait()
        copy(n_full * chunk_rows, tail, slot).start()

    # Drain: the last min(_NBUF, n_chunks) DMAs are still in flight, one per
    # slot; wait each with a descriptor of the matching byte count.
    for c in range(max(0, n_chunks - _NBUF), n_chunks):
        rows = tail if (tail and c == n_chunks - 1) else chunk_rows
        copy(0, rows, c % _NBUF).wait()


def flatten(x: jax.Array) -> jax.Array:
    """torch `x.view(x.size(0), -1)`.

    Flatten is a metadata-only reshape of a contiguous array; XLA lowers it to
    a bitcast, so this is the fastest possible implementation on every TPU
    generation (no kernel, no HBM traffic).
    """
    b = x.shape[0]
    flat = math.prod(x.shape[1:]) if x.ndim > 1 else 1
    return x.reshape(b, flat)


def flatten_copy(x: jax.Array) -> jax.Array:
    """Flatten that also materializes a fresh output buffer.

    Only useful when a new allocation is explicitly required; otherwise call
    `flatten()`.  Implemented as chunked HBM->HBM DMA (no VMEM round trip).
    """
    b = x.shape[0]
    flat = math.prod(x.shape[1:]) if x.ndim > 1 else 1
    total = b * flat
    itemsize = jnp.dtype(x.dtype).itemsize

    if total == 0 or total % 128 != 0:
        # Odd element counts: the metadata reshape is the only sensible answer.
        return x.reshape(b, flat)

    # Present the tensor as a lane-dense (m, 128) slab; the DMA copy is
    # bit-exact row-major, so folding B into the flattened axis is safe and the
    # surrounding reshapes are free.
    n = 128
    m = total // n
    row_bytes = n * itemsize

    # Chunk size: multi-MiB, capped so that (when the tensor is big enough)
    # at least _NBUF chunks exist and the DMA ring actually overlaps.
    cap_rows = max(1, _TARGET_CHUNK_BYTES // row_bytes)
    chunk_rows = min(m, cap_rows)
    if m >= _NBUF:
        chunk_rows = max(1, min(chunk_rows, m // _NBUF))

    slab = x.reshape(m, n)
    out = pl.pallas_call(
        functools.partial(_flatten_dma_kernel, chunk_rows=chunk_rows, m=m),
        out_shape=jax.ShapeDtypeStruct((m, n), x.dtype),
        in_specs=[pl.BlockSpec(memory_space=pl.ANY)],
        out_specs=pl.BlockSpec(memory_space=pl.ANY),
        scratch_shapes=[pltpu.SemaphoreType.DMA((_NBUF,))],
        cost_estimate=pl.CostEstimate(
            flops=0, transcendentals=0, bytes_accessed=2 * total * itemsize
        ),
    )(slab)
    return out.reshape(b, flat)


if __name__ == "__main__":
    key = jax.random.PRNGKey(0)
    # Small shapes consistent with a conv feature map: B=2, C=4, H=W=16.
    x = jax.random.normal(key, (2, 4, 16, 16), dtype=jnp.float32)

    # Default path: free metadata reshape (what the module should ship).
    y = jax.block_until_ready(flatten(x))
    # Materializing path: exercises the Pallas HBM->HBM DMA kernel on TPU.
    y_copy = jax.block_until_ready(flatten_copy(x))

    # Reference: plain-JAX flatten (same semantics as torch .view(B, -1)).
    y_ref = x.reshape(x.shape[0], -1)

    assert y.shape == (2, 4 * 16 * 16), y.shape
    assert y_copy.shape == (2, 4 * 16 * 16), y_copy.shape
    assert y.dtype == x.dtype and y_copy.dtype == x.dtype
    assert bool(jnp.array_equal(y, y_ref)), "flatten (reshape path) mismatch"
    assert bool(jnp.array_equal(y_copy, y_ref)), "flatten (DMA copy path) mismatch"

    print("KERNEL_OK")
</pallas_src>

<mosaic_0001>
module attributes {stable_mosaic.version = 11 : i64} {
  func.func @_flatten_dma_kernel(%arg0: memref<16x128xf32, #tpu.memory_space<any>>, %arg1: memref<16x128xf32, #tpu.memory_space<any>>, %arg2: memref<4x!tpu.dma_semaphore, #tpu.memory_space<semaphore_mem>>) attributes {dimension_semantics = [], scalar_prefetch = 0 : i64, scratch_operands = 1 : i64, tpu.core_type = #tpu.core_type<tc>} {
    %c0_i32 = arith.constant 0 : i32
    %c4_i32 = arith.constant 4 : i32
    %0 = arith.addi %c0_i32, %c4_i32 : i32
    %c1_i32 = arith.constant 1 : i32
    scf.for %arg3 = %c0_i32 to %0 step %c1_i32  : i32 {
      %c1_i32_19 = arith.constant 1 : i32
      %17 = arith.muli %arg3, %c1_i32_19 : i32
      %c0_i32_20 = arith.constant 0 : i32
      %18 = arith.addi %c0_i32_20, %17 : i32
      %c4_i32_21 = arith.constant 4 : i32
      %c0_i32_22 = arith.constant 0 : i32
      %19 = arith.cmpi eq, %c4_i32_21, %c0_i32_22 : i32
      %c1_i32_23 = arith.constant 1 : i32
      %20 = arith.select %19, %c1_i32_23, %c4_i32_21 : i32
      %21 = arith.remsi %18, %20 : i32
      %c0_i32_24 = arith.constant 0 : i32
      %22 = arith.cmpi ne, %21, %c0_i32_24 : i32
      %c0_i32_25 = arith.constant 0 : i32
      %23 = arith.cmpi slt, %21, %c0_i32_25 : i32
      %c0_i32_26 = arith.constant 0 : i32
      %24 = arith.cmpi slt, %20, %c0_i32_26 : i32
      %25 = arith.xori %23, %24 : i1
      %26 = arith.andi %25, %22 : i1
      %27 = arith.addi %21, %20 : i32
      %28 = arith.select %26, %27, %21 : i32
      %c4_i32_27 = arith.constant 4 : i32
      %29 = arith.cmpi sge, %18, %c4_i32_27 : i32
      %30 = arith.extui %29 : i1 to i32
      %c0_i32_28 = arith.constant 0 : i32
      %31 = arith.cmpi ne, %30, %c0_i32_28 : i32
      scf.if %31 {
        %c0_i32_32 = arith.constant 0 : i32
        %c0_i32_33 = arith.constant 0 : i32
        %38 = tpu.memref_slice %arg0[%c0_i32_32, %c0_i32_33] : memref<16x128xf32, #tpu.memory_space<any>> -> memref<4x128xf32, #tpu.memory_space<any>>
        %c0_i32_34 = arith.constant 0 : i32
        %c0_i32_35 = arith.constant 0 : i32
        %39 = tpu.memref_slice %arg1[%c0_i32_34, %c0_i32_35] : memref<16x128xf32, #tpu.memory_space<any>> -> memref<4x128xf32, #tpu.memory_space<any>>
        %40 = tpu.memref_slice %arg2[%28] : memref<4x!tpu.dma_semaphore, #tpu.memory_space<semaphore_mem>> -> memref<1x!tpu.dma_semaphore, #tpu.memory_space<semaphore_mem>>
        %41 = tpu.memref_squeeze %40 : memref<1x!tpu.dma_semaphore, #tpu.memory_space<semaphore_mem>> -> memref<!tpu.dma_semaphore, #tpu.memory_space<semaphore_mem>>
        tpu.wait_dma2 semaphore(%41 : memref<!tpu.dma_semaphore, #tpu.memory_space<semaphore_mem>>) src(%38 : memref<4x128xf32, #tpu.memory_space<any>>) dst(%39 : memref<4x128xf32, #tpu.memory_space<any>>)
      } else {
      }
      %c4_i32_29 = arith.constant 4 : i32
      %32 = arith.muli %18, %c4_i32_29 : i32
      %33 = tpu.assume_multiple %32, 4 : i32
      %c0_i32_30 = arith.constant 0 : i32
      %34 = tpu.memref_slice %arg0[%33, %c0_i32_30] : memref<16x128xf32, #tpu.memory_space<any>> -> memref<4x128xf32, #tpu.memory_space<any>>
      %c0_i32_31 = arith.constant 0 : i32
      %35 = tpu.memref_slice %arg1[%33, %c0_i32_31] : memref<16x128xf32, #tpu.memory_space<any>> -> memref<4x128xf32, #tpu.memory_space<any>>
      %36 = tpu.memref_slice %arg2[%28] : memref<4x!tpu.dma_semaphore, #tpu.memory_space<semaphore_mem>> -> memref<1x!tpu.dma_semaphore, #tpu.memory_space<semaphore_mem>>
      %37 = tpu.memref_squeeze %36 : memref<1x!tpu.dma_semaphore, #tpu.memory_space<semaphore_mem>> -> memref<!tpu.dma_semaphore, #tpu.memory_space<semaphore_mem>>
      tpu.enqueue_dma source(%34 : memref<4x128xf32, #tpu.memory_space<any>>) target(%35 : memref<4x128xf32, #tpu.memory_space<any>>) target_semaphore(%37 : memref<!tpu.dma_semaphore, #tpu.memory_space<semaphore_mem>>)
    }
    %c4_i32_0 = arith.constant 4 : i32
    %c0_i32_1 = arith.constant 0 : i32
    %c0_i32_2 = arith.constant 0 : i32
    %c0_i32_3 = arith.constant 0 : i32
    %1 = tpu.memref_slice %arg0[%c0_i32_2, %c0_i32_3] : memref<16x128xf32, #tpu.memory_space<any>> -> memref<4x128xf32, #tpu.memory_space<any>>
    %c0_i32_4 = arith.constant 0 : i32
    %c0_i32_5 = arith.constant 0 : i32
    %2 = tpu.memref_slice %arg1[%c0_i32_4, %c0_i32_5] : memref<16x128xf32, #tpu.memory_space<any>> -> memref<4x128xf32, #tpu.memory_space<any>>
    %3 = tpu.memref_slice %arg2[%c0_i32_1] : memref<4x!tpu.dma_semaphore, #tpu.memory_space<semaphore_mem>> -> memref<1x!tpu.dma_semaphore, #tpu.memory_space<semaphore_mem>>
    %4 = tpu.memref_squeeze %3 : memref<1x!tpu.dma_semaphore, #tpu.memory_space<semaphore_mem>> -> memref<!tpu.dma_semaphore, #tpu.memory_space<semaphore_mem>>
    tpu.wait_dma2 semaphore(%4 : memref<!tpu.dma_semaphore, #tpu.memory_space<semaphore_mem>>) src(%1 : memref<4x128xf32, #tpu.memory_space<any>>) dst(%2 : memref<4x128xf32, #tpu.memory_space<any>>)
    %c1_i32_6 = arith.constant 1 : i32
    %c0_i32_7 = arith.constant 0 : i32
    %c0_i32_8 = arith.constant 0 : i32
    %5 = tpu.memref_slice %arg0[%c0_i32_7, %c0_i32_8] : memref<16x128xf32, #tpu.memory_space<any>> -> memref<4x128xf32, #tpu.memory_space<any>>
    %c0_i32_9 = arith.constant 0 : i32
    %c0_i32_10 = arith.constant 0 : i32
    %6 = tpu.memref_slice %arg1[%c0_i32_9, %c0_i32_10] : memref<16x128xf32, #tpu.memory_space<any>> -> memref<4x128xf32, #tpu.memory_space<any>>
    %7 = tpu.memref_slice %arg2[%c1_i32_6] : memref<4x!tpu.dma_semaphore, #tpu.memory_space<semaphore_mem>> -> memref<1x!tpu.dma_semaphore, #tpu.memory_space<semaphore_mem>>
    %8 = tpu.memref_squeeze %7 : memref<1x!tpu.dma_semaphore, #tpu.memory_space<semaphore_mem>> -> memref<!tpu.dma_semaphore, #tpu.memory_space<semaphore_mem>>
    tpu.wait_dma2 semaphore(%8 : memref<!tpu.dma_semaphore, #tpu.memory_space<semaphore_mem>>) src(%5 : memref<4x128xf32, #tpu.memory_space<any>>) dst(%6 : memref<4x128xf32, #tpu.memory_space<any>>)
    %c2_i32 = arith.constant 2 : i32
    %c0_i32_11 = arith.constant 0 : i32
    %c0_i32_12 = arith.constant 0 : i32
    %9 = tpu.memref_slice %arg0[%c0_i32_11, %c0_i32_12] : memref<16x128xf32, #tpu.memory_space<any>> -> memref<4x128xf32, #tpu.memory_space<any>>
    %c0_i32_13 = arith.constant 0 : i32
    %c0_i32_14 = arith.constant 0 : i32
    %10 = tpu.memref_slice %arg1[%c0_i32_13, %c0_i32_14] : memref<16x128xf32, #tpu.memory_space<any>> -> memref<4x128xf32, #tpu.memory_space<any>>
    %11 = tpu.memref_slice %arg2[%c2_i32] : memref<4x!tpu.dma_semaphore, #tpu.memory_space<semaphore_mem>> -> memref<1x!tpu.dma_semaphore, #tpu.memory_space<semaphore_mem>>
    %12 = tpu.memref_squeeze %11 : memref<1x!tpu.dma_semaphore, #tpu.memory_space<semaphore_mem>> -> memref<!tpu.dma_semaphore, #tpu.memory_space<semaphore_mem>>
    tpu.wait_dma2 semaphore(%12 : memref<!tpu.dma_semaphore, #tpu.memory_space<semaphore_mem>>) src(%9 : memref<4x128xf32, #tpu.memory_space<any>>) dst(%10 : memref<4x128xf32, #tpu.memory_space<any>>)
    %c3_i32 = arith.constant 3 : i32
    %c0_i32_15 = arith.constant 0 : i32
    %c0_i32_16 = arith.constant 0 : i32
    %13 = tpu.memref_slice %arg0[%c0_i32_15, %c0_i32_16] : memref<16x128xf32, #tpu.memory_space<any>> -> memref<4x128xf32, #tpu.memory_space<any>>
    %c0_i32_17 = arith.constant 0 : i32
    %c0_i32_18 = arith.constant 0 : i32
    %14 = tpu.memref_slice %arg1[%c0_i32_17, %c0_i32_18] : memref<16x128xf32, #tpu.memory_space<any>> -> memref<4x128xf32, #tpu.memory_space<any>>
    %15 = tpu.memref_slice %arg2[%c3_i32] : memref<4x!tpu.dma_semaphore, #tpu.memory_space<semaphore_mem>> -> memref<1x!tpu.dma_semaphore, #tpu.memory_space<semaphore_mem>>
    %16 = tpu.memref_squeeze %15 : memref<1x!tpu.dma_semaphore, #tpu.memory_space<semaphore_mem>> -> memref<!tpu.dma_semaphore, #tpu.memory_space<semaphore_mem>>
    tpu.wait_dma2 semaphore(%16 : memref<!tpu.dma_semaphore, #tpu.memory_space<semaphore_mem>>) src(%13 : memref<4x128xf32, #tpu.memory_space<any>>) dst(%14 : memref<4x128xf32, #tpu.memory_space<any>>)
    return
  }
}

</mosaic_0001>

<bundles_post_ra>
// kernel: tpu_custom_call.1
= control target key start
LH: loop header
LB: loop body
LE: loop exit
PB: predicated region body
PF: predicated region fallthrough
CT: control target
= control target key end

     0   :  { %s151_s6 = smov 0   ;;  %s162_s0 = inlined_call_operand.hbm [shape: f32[16,128], index: 0, kind: input, shape index: {}]   ;;  %s163_s1 = inlined_call_operand.hbm [shape: f32[16,128], index: 1, kind: output, shape index: {}]  }
   0x1 LB: > { %p12_p0 = scmp.lt.s32.totalorder %s137_s6, 0  ;;  %s13_s7 = ssub.s32 0, %s137_s6  ;;  %s137_s6 = sphi %s151_s6, %s11_s6  }
   0x2   : > { %s97_s8 = smin.u32 %s137_s6, %s13_s7  ;;  %p108_p1 = scmp.ge.s32.totalorder %s137_s6, 4 }
   0x3   : > { %s15_s9 = sand.u32 3, %s97_s8  }
   0x4   : > { %s16_s10 = ssub.s32 0, %s15_s9 }
   0x5   : > { %s165_s10 = smov (!%p12_p0, %s16_s10), %s15_s9 }
   0x6   : > { %p99_p2 = scmp.lt.s32.totalorder %s165_s10, 0  ;;  %s22_s11 = sadd.s32 4, %s165_s10 }
   0x8   : > { %s167_s11 = smov (!%p99_p2, %s22_s11), %s165_s10 }
   0x9   : > { %s28_s12 = scalar_lea.sflag [#allocation2], %s167_s11 }
   0xa   : > { %124 = dma.done.wait (%p108_p1), %s28_s12, 64 }
   0xb   : > { %126 = vsyncadd (%p108_p1), %s28_s12, 4294967232  ;;  %s101_s13 = sshll.u32 %s137_s6, 2  ;;  %s139_s22 = smov [#allocation3]  }
   0xc   : > { %s33_s16 = scalar_lea.hbm %s162_s0, %s101_s13  ;;  %s34_s19 = scalar_lea.hbm %s163_s1, %s101_s13 }
   0xd   : > { %s40_s20 = sshll.u32 %s33_s16, 4  ;;  %s42_s21 = sshll.u32 %s34_s19, 4  ;;  %s41_s20 = int_to_ptr.hbm [resolvable:$true] %s40_s20  ;;  %s43_s21 = int_to_ptr.hbm [resolvable:$true] %s42_s21 }
   0xe   : > { %s140_s23 = smov 0   ;;  %s11_s6 = sadd.s32 1, %s137_s6  }
   0xf   : > { %46 = dma.general %s41_s20, 64, %s43_s21, %s28_s12, %s139_s22, [#allocation4], %s140_s23, 0  }
  0x10   : > { %p8_p3 = scmp.ge.s32.totalorder %s11_s6, 4  }
  0x12   :  { %10 = sbr.rel (!%p8_p3) target bundleno = 1 (0x1), region = 33 }
  0x17   :  { %127 = dma.done.wait [#allocation2], 64 }
  0x18   :  { %128 = vsyncadd [#allocation2], 4294967232 }
  0x19   :  { %129 = dma.done.wait [#allocation2 + $0x1], 64 }
  0x1a   :  { %130 = vsyncadd [#allocation2 + $0x1], 4294967232 }
  0x1b   :  { %131 = dma.done.wait [#allocation2 + $0x2], 64 }
  0x1c   :  { %132 = vsyncadd [#allocation2 + $0x2], 4294967232 }
  0x1d   :  { %133 = dma.done.wait [#allocation2 + $0x3], 64 }
  0x1e   :  { %134 = vsyncadd [#allocation2 + $0x3], 4294967232 }
  0x1f   :  { %59 = vsyncmov [#allocation2] }
  0x22   :  { %s60_s24 = vpop.sfrf %59 }
  0x23   :  { %p102_p4 = scmp.ne.s32.totalorder %s60_s24, 0 }
  0x25   :  { %64 = shalt.err (%p102_p4)  }
  0x26   :  { %66 = vsyncmov [#allocation2 + $0x1] }
  0x29   :  { %s67_s25 = vpop.sfrf %66 }
  0x2a   :  { %p103_p5 = scmp.ne.s32.totalorder %s67_s25, 0 }
  0x2c   :  { %71 = shalt.err (%p103_p5)  }
  0x2d   :  { %73 = vsyncmov [#allocation2 + $0x2] }
  0x30   :  { %s74_s26 = vpop.sfrf %73 }
  0x31   :  { %p104_p6 = scmp.ne.s32.totalorder %s74_s26, 0 }
  0x33   :  { %78 = shalt.err (%p104_p6)  }
  0x34   :  { %80 = vsyncmov [#allocation2 + $0x3] }
  0x37   :  { %s81_s0 = vpop.sfrf %80 }
  0x38   :  { %p105_p7 = scmp.ne.s32.totalorder %s81_s0, 0 }
  0x3a   :  { %85 = shalt.err (%p105_p7)  }

</bundles_post_ra>
